<compile_context>
chip_gen: v7x
topology: tpu7x:2x2x1
jax: 0.10.0
libtpu: 0.0.40
codegen_flags: <defaults>
</compile_context>

<pallas_src>
import functools

import jax
import jax.numpy as jnp
from jax.experimental import pallas as pl
from jax.experimental.pallas import tpu as pltpu


def _round_up(x, m):
    return ((x + m - 1) // m) * m


# ----------------------------------------------------------------------------
# FUSED kernel: encoder + pooling-mask + L2-norm + InfoNCE loss in one call.
# grid = (E tiles,)  (reduction, "arbitrary"); W is streamed from HBM once.
# ----------------------------------------------------------------------------
def _fused_kernel(x_ref, w_ref, b_ref, m_ref, loss_ref, acc_ref, *,
                  n_query, n_neg_total, inv_temperature):
    k = pl.program_id(0)

    @pl.when(k == 0)
    def _():
        acc_ref[...] = jnp.zeros_like(acc_ref)

    acc_ref[...] += jnp.dot(x_ref[...], w_ref[...],
                            preferred_element_type=jnp.float32)

    @pl.when(k == pl.num_programs(0) - 1)
    def _():
        h = jnp.tanh(acc_ref[...] + b_ref[...]) * m_ref[...]          # (Tp, Hp)
        ss = jnp.sum(h * h, axis=-1, keepdims=True)
        # torch F.normalize(p=2, eps=1e-12): x / max(||x||, 1e-12)
        z = h * jax.lax.rsqrt(jnp.maximum(ss, 1e-24))                  # (Tp, Hp)

        bq = n_query
        q = z[:bq]                                                     # (B, Hp)
        p = z[bq:2 * bq]                                               # (B, Hp)
        n = z[2 * bq:2 * bq + n_neg_total]                             # (NB, Hp)

        pos = jnp.sum(q * p, axis=-1, keepdims=True) * inv_temperature           # (B, 1)
        # negatives kept (NB, H): transposed contraction, H stays lane-dense.
        neg = jax.lax.dot_general(q, n, (((1,), (1,)), ((), ())),
                                  preferred_element_type=jnp.float32) * inv_temperature  # (B, NB)

        mx = jnp.maximum(pos, jnp.max(neg, axis=-1, keepdims=True))
        sumexp = jnp.exp(pos - mx) + jnp.sum(jnp.exp(neg - mx), axis=-1, keepdims=True)
        lse = mx + jnp.log(sumexp)                                                 # (B, 1)
        loss_ref[...] = jnp.mean(lse - pos, axis=0, keepdims=True)                 # (1, 1)


def _fused_loss(x, mval, w, b, n_query, n_neg_total, temperature, *, te_max=512):
    """x: (T, E) selected-token embeddings; mval: (T, 1) mask value at gathered
    position; w: (E, H); b: (1, H).  Returns the scalar InfoNCE loss."""
    T, E = x.shape
    H = w.shape[1]

    Tp = _round_up(T, 16)                     # bf16 sublane packing
    Hp = _round_up(H, 128)                    # lane-dense hidden width
    TE = min(te_max, _round_up(E, 128))       # K tile over E
    Ep = _round_up(E, TE)

    # bf16 operands, f32 accumulation; zero padding contributes nothing
    # (bias pad = 0, mval = 0 zeroes padded rows before the norm / slices
    # never touch padded rows).
    xp = jnp.zeros((Tp, Ep), jnp.bfloat16).at[:T, :E].set(x.astype(jnp.bfloat16))
    wp = jnp.zeros((Ep, Hp), jnp.bfloat16).at[:E, :H].set(w.astype(jnp.bfloat16))
    bp = jnp.zeros((1, Hp), jnp.float32).at[:, :H].set(b.astype(jnp.float32))
    mp = jnp.zeros((Tp, 1), jnp.float32).at[:T].set(mval.astype(jnp.float32))

    kernel = functools.partial(_fused_kernel, n_query=n_query,
                               n_neg_total=n_neg_total,
                               inv_temperature=float(1.0 / temperature))
    loss = pl.pallas_call(
        kernel,
        out_shape=jax.ShapeDtypeStruct((1, 1), jnp.float32),
        grid_spec=pltpu.PrefetchScalarGridSpec(
            num_scalar_prefetch=0,
            grid=(Ep // TE,),
            in_specs=[
                pl.BlockSpec((Tp, TE), lambda k: (0, k)),   # x: K-tile stream
                pl.BlockSpec((TE, Hp), lambda k: (k, 0)),   # W: streamed exactly once
                pl.BlockSpec((1, Hp), lambda k: (0, 0)),    # bias: resident
                pl.BlockSpec((Tp, 1), lambda k: (0, 0)),    # mask value per row
            ],
            out_specs=pl.BlockSpec((1, 1), lambda k: (0, 0)),
            scratch_shapes=[pltpu.VMEM((Tp, Hp), jnp.float32)],   # f32 accumulator
        ),
        compiler_params=pltpu.CompilerParams(
            dimension_semantics=("arbitrary",),
            vmem_limit_bytes=48 * 1024 * 1024,   # safe on v7x (64 MiB physical)
        ),
    )(xp, wp, bp, mp)
    return loss[0, 0]


# ----------------------------------------------------------------------------
# UNFUSED fallback, kernel 1: encode selected tokens, accumulate directly into
# the f32 output ref (no acc scratch), L2-norm fused into the epilogue.
# ----------------------------------------------------------------------------
def _encode_kernel(x_ref, w_ref, b_ref, m_ref, o_ref):
    k = pl.program_id(1)

    @pl.when(k == 0)
    def _():
        o_ref[...] = jnp.zeros_like(o_ref)

    o_ref[...] += jnp.dot(x_ref[...], w_ref[...],
                          preferred_element_type=jnp.float32)

    @pl.when(k == pl.num_programs(1) - 1)
    def _():
        h = jnp.tanh(o_ref[...] + b_ref[...]) * m_ref[...]             # (TM, Hp)
        ss = jnp.sum(h * h, axis=-1, keepdims=True)
        o_ref[...] = h * jax.lax.rsqrt(jnp.maximum(ss, 1e-24))


def encode(x, mval, w, b, *, tm_max=256, te_max=512):
    """Returns L2-normalized pooled embeddings, (T, H) float32."""
    T, E = x.shape
    H = w.shape[1]

    TM = min(tm_max, _round_up(T, 16))        # bf16 packs 16 rows/sublane vreg
    Tp = _round_up(T, TM)                     # T <= tm_max => 1 row tile => W streams once
    TE = min(te_max, _round_up(E, 128))
    Ep = _round_up(E, TE)
    Hp = _round_up(H, 128)
    # TODO(synk): for very large H add an H/N grid axis + a separate norm pass
    #             (the fused L2 norm needs the full row), so VMEM stays bounded.

    xp = jnp.zeros((Tp, Ep), jnp.bfloat16).at[:T, :E].set(x.astype(jnp.bfloat16))
    wp = jnp.zeros((Ep, Hp), jnp.bfloat16).at[:E, :H].set(w.astype(jnp.bfloat16))
    bp = jnp.zeros((1, Hp), jnp.float32).at[:, :H].set(b.astype(jnp.float32))
    mp = jnp.zeros((Tp, 1), jnp.float32).at[:T].set(mval.astype(jnp.float32))

    grid = (Tp // TM, Ep // TE)
    out = pl.pallas_call(
        _encode_kernel,
        out_shape=jax.ShapeDtypeStruct((Tp, Hp), jnp.float32),
        grid_spec=pltpu.PrefetchScalarGridSpec(
            num_scalar_prefetch=0,
            grid=grid,
            in_specs=[
                pl.BlockSpec((TM, TE), lambda i, k: (i, k)),   # x: row/K tile
                pl.BlockSpec((TE, Hp), lambda i, k: (k, 0)),   # W: K stream (once when 1 row tile)
                pl.BlockSpec((1, Hp), lambda i, k: (0, 0)),    # bias: resident
                pl.BlockSpec((TM, 1), lambda i, k: (i, 0)),    # mask value per row
            ],
            out_specs=pl.BlockSpec((TM, Hp), lambda i, k: (i, 0)),   # f32 accumulator in-place
        ),
        compiler_params=pltpu.CompilerParams(
            dimension_semantics=("parallel", "arbitrary"),
            vmem_limit_bytes=48 * 1024 * 1024,
        ),
    )(xp, wp, bp, mp)
    return out[:T, :H]


# ----------------------------------------------------------------------------
# UNFUSED fallback, kernel 2: InfoNCE loss tiled over negatives (NB) with an
# online running max / sum-exp; negatives stay (NB, H) (no wrapper transpose).
# ----------------------------------------------------------------------------
def _loss_kernel(q_ref, p_ref, n_ref, w_ref, loss_ref, pos_sc, m_sc, s_sc, *,
                 n_neg_total, tile_nb, inv_temperature):
    j = pl.program_id(0)

    @pl.when(j == 0)
    def _():
        pos = jnp.sum(q_ref[...] * p_ref[...], axis=-1, keepdims=True) * inv_temperature
        pos_sc[...] = pos
        m_sc[...] = pos
        s_sc[...] = jnp.ones_like(s_sc)        # exp(pos - pos)

    neg = jax.lax.dot_general(q_ref[...], n_ref[...], (((1,), (1,)), ((), ())),
                              preferred_element_type=jnp.float32) * inv_temperature  # (Bp, TNB)
    col = jax.lax.broadcasted_iota(jnp.int32, neg.shape, 1) + j * tile_nb
    neg = jnp.where(col < n_neg_total, neg, -jnp.inf)   # mask padded negative cols

    m_new = jnp.maximum(m_sc[...], jnp.max(neg, axis=-1, keepdims=True))
    alpha = jnp.exp(m_sc[...] - m_new)
    s_sc[...] = alpha * s_sc[...] + jnp.sum(jnp.exp(neg - m_new), axis=-1, keepdims=True)
    m_sc[...] = m_new

    @pl.when(j == pl.num_programs(0) - 1)
    def _():
        lse = m_sc[...] + jnp.log(s_sc[...])                           # (Bp, 1)
        # w_ref holds 1/B on valid rows, 0 on padded rows
        loss_ref[...] = jnp.sum((lse - pos_sc[...]) * w_ref[...], axis=0, keepdims=True)


def contrastive_loss(q, p, n, temperature, *, tnb_max=512):
    """q, p: (B, H) normalized; n: (NB, H) normalized."""
    B, H = q.shape
    NB = n.shape[0]
    Bp = _round_up(B, 8)
    TNB = min(tnb_max, _round_up(NB, 128))
    NBp = _round_up(NB, TNB)

    qp = jnp.zeros((Bp, H), jnp.float32).at[:B].set(q.astype(jnp.float32))
    pp = jnp.zeros((Bp, H), jnp.float32).at[:B].set(p.astype(jnp.float32))
    npad = jnp.zeros((NBp, H), jnp.float32).at[:NB].set(n.astype(jnp.float32))
    wrow = jnp.zeros((Bp, 1), jnp.float32).at[:B].set(1.0 / B)

    kernel = functools.partial(_loss_kernel, n_neg_total=NB, tile_nb=TNB,
                               inv_temperature=float(1.0 / temperature))
    loss = pl.pallas_call(
        kernel,
        out_shape=jax.ShapeDtypeStruct((1, 1), jnp.float32),
        grid_spec=pltpu.PrefetchScalarGridSpec(
            num_scalar_prefetch=0,
            grid=(NBp // TNB,),
            in_specs=[
                pl.BlockSpec((Bp, H), lambda j: (0, 0)),     # q resident
                pl.BlockSpec((Bp, H), lambda j: (0, 0)),     # p resident
                pl.BlockSpec((TNB, H), lambda j: (j, 0)),    # negatives streamed
                pl.BlockSpec((Bp, 1), lambda j: (0, 0)),     # row weights
            ],
            out_specs=pl.BlockSpec((1, 1), lambda j: (0, 0)),
            scratch_shapes=[pltpu.VMEM((Bp, 1), jnp.float32)] * 3,
        ),
        compiler_params=pltpu.CompilerParams(
            dimension_semantics=("arbitrary",),
            vmem_limit_bytes=48 * 1024 * 1024,
        ),
    )(qp, pp, npad, wrow)
    return loss[0, 0]


# ----------------------------------------------------------------------------
# Full forward (glue in plain JAX: gather index math, tiny gathers, concat)
# ----------------------------------------------------------------------------
def embedding_model_forward(params, query_ids, query_mask, pos_ids, pos_mask,
                            neg_ids, neg_mask, temperature=0.02, *,
                            force_unfused=False):
    emb_table, W, b = params["emb"], params["W"], params["b"]
    B, S = query_ids.shape
    N = neg_ids.shape[0]          # number of negative groups (python list in torch)
    NB = N * B

    all_ids = jnp.concatenate(
        [query_ids, pos_ids, neg_ids.reshape(NB, S)], axis=0)                  # (T, S)
    all_mask = jnp.concatenate(
        [query_mask, pos_mask, neg_mask.reshape(NB, S)], axis=0
    ).astype(jnp.float32)                                                      # (T, S)
    T = all_ids.shape[0]

    # torch mean_pooling gather index: position of the LAST mask==1 token
    # (index 0 if the mask is all-zero) and the mask VALUE at that position.
    rev = all_mask[:, ::-1]
    values = jnp.max(rev, axis=1)
    idx = jnp.argmax(rev, axis=1)
    idx = jnp.where(values == 0, S - 1, idx)
    gidx = (S - idx - 1).astype(jnp.int32)                                     # (T,)
    mval = jnp.take_along_axis(all_mask, gidx[:, None], axis=1)                # (T, 1)

    # Gather BEFORE the encoder matmul: pooling keeps exactly one token per
    # sequence, so only T embedding rows are ever needed.
    # TODO(synk): gather could be fused into the encoder via scalar-prefetch
    #             row index_map; low priority per review.
    sel_ids = jnp.take_along_axis(all_ids, gidx[:, None], axis=1)[:, 0]        # (T,)
    sel_emb = jnp.take(emb_table, sel_ids, axis=0)                             # (T, E)

    H = W.shape[1]
    Tp, Hp = _round_up(T, 16), _round_up(H, 128)
    # Fused path when the (Tp, Hp) f32 accumulator and the epilogue comfortably
    # fit VMEM (typical contrastive batches); otherwise tile rows / negatives.
    fuse = (not force_unfused) and (Tp <= 1024) and (Tp * Hp * 4 <= 8 * 1024 * 1024)
    if fuse:
        return _fused_loss(sel_emb, mval, W, b, B, NB, temperature)

    pooled = encode(sel_emb, mval, W, b)        # (T, H), L2-normalized f32
    q = pooled[:B]
    p = pooled[B:2 * B]
    n = pooled[2 * B:]                          # (NB, H): NO transpose
    return contrastive_loss(q, p, n, temperature)


# ----------------------------------------------------------------------------
# Pure-JAX reference (mirrors the torch code literally) for verification
# ----------------------------------------------------------------------------
def _reference_loss(params, q_ids, q_mask, p_ids, p_mask, n_ids, n_mask, temperature=0.02):
    emb_table = params["emb"].astype(jnp.float32)
    W = params["W"].astype(jnp.float32)
    b = params["b"].astype(jnp.float32)

    def encode_ref(ids, mask):
        h = jnp.tanh(emb_table[ids] @ W + b)          # (bs, S, H)
        bs, S, H = h.shape
        rev = mask[:, ::-1]
        values = rev.max(axis=1)
        idx = jnp.argmax(rev, axis=1)
        idx = jnp.where(values == 0, S - 1, idx)
        gidx = S - idx - 1
        masked = h * mask[..., None].astype(h.dtype)
        gi = jnp.broadcast_to(gidx[:, None, None], (bs, 1, H))
        return jnp.take_along_axis(masked, gi, axis=1)[:, 0, :]

    q = encode_ref(q_ids, q_mask)
    p = encode_ref(p_ids, p_mask)
    n = jnp.concatenate([encode_ref(n_ids[i], n_mask[i]) for i in range(n_ids.shape[0])], axis=0)

    def norm(x):
        return x / jnp.maximum(jnp.linalg.norm(x, axis=-1, keepdims=True), 1e-12)

    q, p, n = norm(q), norm(p), norm(n)
    pos = jnp.sum(q * p, axis=-1)
    neg = q @ n.T
    scores = jnp.concatenate([pos[:, None], neg], axis=1) / temperature
    logz = jax.nn.logsumexp(scores, axis=1)
    return jnp.mean(logz - scores[:, 0])


if __name__ == "__main__":
    key = jax.random.PRNGKey(0)
    B, S, N_NEG = 2, 8, 3
    VOCAB, E, H = 64, 128, 128            # lane-dense (multiples of 128) hidden dims

    ks = jax.random.split(key, 9)
    # Params stored in bf16 (embedding table, W) with f32 bias: halves HBM/VMEM
    # bytes and doubles MXU throughput; accumulation stays in f32.
    emb_table = (jax.random.normal(ks[0], (VOCAB, E), jnp.float32) * 0.1).astype(jnp.bfloat16)
    W = (jax.random.normal(ks[1], (E, H), jnp.float32) * 0.1).astype(jnp.bfloat16)
    b = jax.random.normal(ks[2], (1, H), jnp.float32) * 0.01
    params = {"emb": emb_table, "W": W, "b": b}

    query_ids = jax.random.randint(ks[3], (B, S), 0, VOCAB)
    pos_ids = jax.random.randint(ks[4], (B, S), 0, VOCAB)
    neg_ids = jax.random.randint(ks[5], (N_NEG, B, S), 0, VOCAB)

    def make_mask(k, shape):
        lens = jax.random.randint(k, shape[:-1], 1, shape[-1] + 1)
        return (jnp.arange(shape[-1]) < lens[..., None]).astype(jnp.int32)

    query_mask = make_mask(ks[6], (B, S))
    pos_mask = make_mask(ks[7], (B, S))
    neg_mask = make_mask(ks[8], (N_NEG, B, S))

    ref = _reference_loss(params, query_ids, query_mask, pos_ids, pos_mask,
                          neg_ids, neg_mask, temperature=0.02)

    # Fused single-kernel path (default at these sizes)
    loss_fused = embedding_model_forward(params, query_ids, query_mask, pos_ids,
                                         pos_mask, neg_ids, neg_mask,
                                         temperature=0.02)
    loss_fused = jax.block_until_ready(loss_fused)
    assert jnp.allclose(loss_fused, ref, atol=1e-3, rtol=1e-3), (loss_fused, ref)

    # Unfused (tiled encoder + tiled online-logsumexp loss) path, exercised for
    # coverage of the large-shape code path.
    loss_unfused = embedding_model_forward(params, query_ids, query_mask, pos_ids,
                                           pos_mask, neg_ids, neg_mask,
                                           temperature=0.02, force_unfused=True)
    loss_unfused = jax.block_until_ready(loss_unfused)
    assert jnp.allclose(loss_unfused, ref, atol=1e-3, rtol=1e-3), (loss_unfused, ref)

    print("KERNEL_OK")
</pallas_src>

<mosaic_0001>
module attributes {stable_mosaic.version = 11 : i64} {
  func.func @_fused_kernel(%arg0: i32, %arg1: memref<16x128xbf16, #tpu.memory_space<vmem>>, %arg2: memref<128x128xbf16, #tpu.memory_space<vmem>>, %arg3: memref<1x128xf32, #tpu.memory_space<vmem>>, %arg4: memref<16x1xf32, #tpu.memory_space<vmem>>, %arg5: memref<1x1xf32, #tpu.memory_space<vmem>>, %arg6: memref<16x128xf32, #tpu.memory_space<vmem>>) attributes {dimension_semantics = [#tpu.dimension_semantics<arbitrary>], iteration_bounds = array<i64: 1>, scalar_prefetch = 0 : i64, scratch_operands = 1 : i64, tpu.core_type = #tpu.core_type<tc>, window_params = [{transform_indices = @transform_0, window_bounds = array<i64: 16, 128>}, {transform_indices = @transform_1, window_bounds = array<i64: 128, 128>}, {pipeline_mode = #tpu.pipeline_mode<synchronous>, transform_indices = @transform_2, window_bounds = array<i64: 1, 128>}, {pipeline_mode = #tpu.pipeline_mode<synchronous>, transform_indices = @transform_3, window_bounds = array<i64: 16, 1>}, {pipeline_mode = #tpu.pipeline_mode<synchronous>, transform_indices = @transform_4, window_bounds = array<i64: 1, 1>}]} {
    %c0_i32 = arith.constant 0 : i32
    %0 = arith.cmpi eq, %arg0, %c0_i32 : i32
    %1 = arith.extui %0 : i1 to i32
    %c0_i32_0 = arith.constant 0 : i32
    %2 = arith.cmpi ne, %1, %c0_i32_0 : i32
    scf.if %2 {
      %cst_10 = arith.constant 0.000000e+00 : f32
      %12 = vector.broadcast %cst_10 : f32 to vector<16x128xf32>
      %c0_11 = arith.constant 0 : index
      %c0_12 = arith.constant 0 : index
      %13 = vector.load %arg6[%c0_11, %c0_12] : memref<16x128xf32, #tpu.memory_space<vmem>>, vector<16x128xf32>
      tpu.vector_store %arg6[%c0_11, %c0_12], %12 {strides = array<i32>} : memref<16x128xf32, #tpu.memory_space<vmem>>, vector<16x128xf32>,
    } else {
    }
    %c0 = arith.constant 0 : index
    %c0_1 = arith.constant 0 : index
    %3 = vector.load %arg6[%c0, %c0_1] : memref<16x128xf32, #tpu.memory_space<vmem>>, vector<16x128xf32>
    %c0_2 = arith.constant 0 : index
    %c0_3 = arith.constant 0 : index
    %4 = vector.load %arg1[%c0_2, %c0_3] : memref<16x128xbf16, #tpu.memory_space<vmem>>, vector<16x128xbf16>
    %c0_4 = arith.constant 0 : index
    %c0_5 = arith.constant 0 : index
    %5 = vector.load %arg2[%c0_4, %c0_5] : memref<128x128xbf16, #tpu.memory_space<vmem>>, vector<128x128xbf16>
    %cst = arith.constant dense<0.000000e+00> : vector<16x128xf32>
    %6 = tpu.matmul %4, %5, %cst {dimension_numbers = #tpu.dot_dimension_numbers<[1], [0], [0], [1], [0, 0, 1, 1], [], []>} : vector<16x128xbf16>, vector<128x128xbf16>, vector<16x128xf32> -> vector<16x128xf32>
    %7 = arith.addf %3, %6 : vector<16x128xf32>
    %c0_6 = arith.constant 0 : index
    %c0_7 = arith.constant 0 : index
    %8 = vector.load %arg6[%c0_6, %c0_7] : memref<16x128xf32, #tpu.memory_space<vmem>>, vector<16x128xf32>
    tpu.vector_store %arg6[%c0_6, %c0_7], %7 {strides = array<i32>} : memref<16x128xf32, #tpu.memory_space<vmem>>, vector<16x128xf32>,
    %c0_i32_8 = arith.constant 0 : i32
    %9 = arith.cmpi eq, %arg0, %c0_i32_8 : i32
    %10 = arith.extui %9 : i1 to i32
    %c0_i32_9 = arith.constant 0 : i32
    %11 = arith.cmpi ne, %10, %c0_i32_9 : i32
    scf.if %11 {
      %c0_10 = arith.constant 0 : index
      %c0_11 = arith.constant 0 : index
      %12 = vector.load %arg6[%c0_10, %c0_11] : memref<16x128xf32, #tpu.memory_space<vmem>>, vector<16x128xf32>
      %c0_12 = arith.constant 0 : index
      %c0_13 = arith.constant 0 : index
      %13 = vector.load %arg3[%c0_12, %c0_13] : memref<1x128xf32, #tpu.memory_space<vmem>>, vector<1x128xf32>
      %14 = vector.broadcast %13 : vector<1x128xf32> to vector<16x128xf32>
      %15 = arith.addf %12, %14 : vector<16x128xf32>
      %16 = math.tanh %15 : vector<16x128xf32>
      %c0_14 = arith.constant 0 : index
      %c0_15 = arith.constant 0 : index
      %17 = vector.load %arg4[%c0_14, %c0_15] : memref<16x1xf32, #tpu.memory_space<vmem>>, vector<16x1xf32>
      %18 = vector.broadcast %17 : vector<16x1xf32> to vector<16x128xf32>
      %19 = arith.mulf %16, %18 : vector<16x128xf32>
      %20 = arith.mulf %19, %19 : vector<16x128xf32>
      %cst_16 = arith.constant dense<0.000000e+00> : vector<16xf32>
      %21 = vector.multi_reduction <add>, %20, %cst_16 [1] : vector<16x128xf32> to vector<16xf32>
      %22 = vector.shape_cast %21 : vector<16xf32> to vector<16x1xf32>
      %cst_17 = arith.constant 1.000000e-24 : f32
      %23 = vector.broadcast %cst_17 : f32 to vector<16x1xf32>
      %24 = arith.maximumf %22, %23 : vector<16x1xf32>
      %25 = math.rsqrt %24 : vector<16x1xf32>
      %26 = vector.broadcast %25 : vector<16x1xf32> to vector<16x128xf32>
      %27 = arith.mulf %19, %26 : vector<16x128xf32>
      %28 = vector.extract_strided_slice %27 {offsets = [0, 0], sizes = [2, 128], strides = [1, 1]} : vector<16x128xf32> to vector<2x128xf32>
      %29 = vector.extract_strided_slice %27 {offsets = [2, 0], sizes = [2, 128], strides = [1, 1]} : vector<16x128xf32> to vector<2x128xf32>
      %30 = vector.extract_strided_slice %27 {offsets = [4, 0], sizes = [6, 128], strides = [1, 1]} : vector<16x128xf32> to vector<6x128xf32>
      %31 = arith.mulf %28, %29 : vector<2x128xf32>
      %cst_18 = arith.constant dense<0.000000e+00> : vector<2xf32>
      %32 = vector.multi_reduction <add>, %31, %cst_18 [1] : vector<2x128xf32> to vector<2xf32>
      %33 = vector.shape_cast %32 : vector<2xf32> to vector<2x1xf32>
      %cst_19 = arith.constant 5.000000e+01 : f32
      %34 = vector.broadcast %cst_19 : f32 to vector<2x1xf32>
      %35 = arith.mulf %33, %34 : vector<2x1xf32>
      %cst_20 = arith.constant dense<0.000000e+00> : vector<2x6xf32>
      %36 = tpu.matmul %28, %30, %cst_20 {dimension_numbers = #tpu.dot_dimension_numbers<[1], [1], [0], [0], [0, 0, 1, 0], [], []>} : vector<2x128xf32>, vector<6x128xf32>, vector<2x6xf32> -> vector<2x6xf32>
      %cst_21 = arith.constant 5.000000e+01 : f32
      %37 = vector.broadcast %cst_21 : f32 to vector<2x6xf32>
      %38 = arith.mulf %36, %37 : vector<2x6xf32>
      %cst_22 = arith.constant dense<0xFF800000> : vector<2xf32>
      %39 = vector.multi_reduction <maximumf>, %38, %cst_22 [1] : vector<2x6xf32> to vector<2xf32>
      %40 = vector.shape_cast %39 : vector<2xf32> to vector<2x1xf32>
      %41 = arith.maximumf %35, %40 : vector<2x1xf32>
      %42 = arith.subf %35, %41 : vector<2x1xf32>
      %43 = math.exp %42 : vector<2x1xf32>
      %44 = vector.broadcast %41 : vector<2x1xf32> to vector<2x6xf32>
      %45 = arith.subf %38, %44 : vector<2x6xf32>
      %46 = math.exp %45 : vector<2x6xf32>
      %cst_23 = arith.constant dense<0.000000e+00> : vector<2xf32>
      %47 = vector.multi_reduction <add>, %46, %cst_23 [1] : vector<2x6xf32> to vector<2xf32>
      %48 = vector.shape_cast %47 : vector<2xf32> to vector<2x1xf32>
      %49 = arith.addf %43, %48 : vector<2x1xf32>
      %50 = math.log %49 : vector<2x1xf32>
      %51 = arith.addf %41, %50 : vector<2x1xf32>
      %52 = arith.subf %51, %35 : vector<2x1xf32>
      %cst_24 = arith.constant dense<0.000000e+00> : vector<1xf32>
      %53 = vector.multi_reduction <add>, %52, %cst_24 [0] : vector<2x1xf32> to vector<1xf32>
      %54 = vector.shape_cast %53 : vector<1xf32> to vector<1x1xf32>
      %cst_25 = arith.constant 2.000000e+00 : f32
      %55 = vector.broadcast %cst_25 : f32 to vector<1x1xf32>
      %56 = arith.divf %54, %55 : vector<1x1xf32>
      %c0_26 = arith.constant 0 : index
      %c0_27 = arith.constant 0 : index
      %57 = vector.load %arg5[%c0_26, %c0_27] : memref<1x1xf32, #tpu.memory_space<vmem>>, vector<1x1xf32>
      tpu.vector_store %arg5[%c0_26, %c0_27], %56 {strides = array<i32>} : memref<1x1xf32, #tpu.memory_space<vmem>>, vector<1x1xf32>,
    } else {
    }
    return
  }
  func.func @transform_0(%arg0: i32) -> (i32, i32) {
    %c0_i32 = arith.constant 0 : i32
    %c0_i32_0 = arith.constant 0 : i32
    return %c0_i32, %arg0 : i32, i32
  }
  func.func @transform_1(%arg0: i32) -> (i32, i32) {
    %c0_i32 = arith.constant 0 : i32
    %c0_i32_0 = arith.constant 0 : i32
    return %arg0, %c0_i32 : i32, i32
  }
  func.func @transform_2(%arg0: i32) -> (i32, i32) {
    %c0_i32 = arith.constant 0 : i32
    %c0_i32_0 = arith.constant 0 : i32
    %c0_i32_1 = arith.constant 0 : i32
    return %c0_i32, %c0_i32_0 : i32, i32
  }
  func.func @transform_3(%arg0: i32) -> (i32, i32) {
    %c0_i32 = arith.constant 0 : i32
    %c0_i32_0 = arith.constant 0 : i32
    %c0_i32_1 = arith.constant 0 : i32
    return %c0_i32, %c0_i32_0 : i32, i32
  }
  func.func @transform_4(%arg0: i32) -> (i32, i32) {
    %c0_i32 = arith.constant 0 : i32
    %c0_i32_0 = arith.constant 0 : i32
    %c0_i32_1 = arith.constant 0 : i32
    return %c0_i32, %c0_i32_0 : i32, i32
  }
}

</mosaic_0001>

<bundles_post_ra>
// kernel: tpu_custom_call.1
= control target key start
LH: loop header
LB: loop body
LE: loop exit
PB: predicated region body
PF: predicated region fallthrough
CT: control target
= control target key end

     0   :  { %9 = vsyncpa [#allocation4], 0  ;;  %s526_s0 = inlined_call_operand.vmem [shape: bf16[16,128], index: 0, kind: input, shape index: {}]   ;;  %s527_s1 = inlined_call_operand.hbm [shape: bf16[128,128], index: 1, kind: input, shape index: {}]   ;;  %s528_s2 = inlined_call_operand.vmem [shape: f32[1,128], index: 2, kind: input, shape index: {}]   ;;  %s529_s3 = inlined_call_operand.vmem [shape: f32[16,1], index: 3, kind: input, shape index: {}]   ;;  %s530_s4 = inlined_call_operand.hbm [shape: f32[1,1], index: 4, kind: output, shape index: {}]  }
   0x1   :  { %10 = vsyncpa [#allocation5], 0  ;;  %s456_s15 = smov [#allocation3]   ;;  %s408_s19 = scalar_lea.hbm %s527_s1, 1024 }
   0x2   :  { %s18_s16 = sshll.u32 %s456_s15, 4  ;;  %p409_p0 = scmp.ne.s32.totalorder %s527_s1, %s408_s19  ;;  %s19_s16 = int_to_ptr.vmem [resolvable:$true] %s18_s16 }
   0x3   :  { %p412_p1 = scmp.lt.u32.totalorder %s408_s19, %s527_s1 }
   0x5   :  { %p414_p2 = pnand %p412_p1, %p409_p0 }
   0x7   :  { %417 = shalt.err (!%p414_p2)
}
   0x8   :  { %s418_s24 = scalar_lea.vmem %s19_s16, 1024  ;;  %p423_p4 = scmp.lt.s32.totalorder %s19_s16, %s19_s16 }
   0x9   :  { %p419_p3 = scmp.ne.s32.totalorder %s19_s16, %s418_s24  ;;  %p424_p5 = scmp.lt.s32.totalorder %s418_s24, %s418_s24 }
   0xb   :  { %p425_p6 = por %p424_p5, %p423_p4 }
   0xd   :  { %p426_p7 = pnand %p425_p6, %p419_p3 }
   0xf   :  { %429 = shalt.err (!%p426_p7)
}
  0x10   :  { %s457_s25 = smov 64   ;;  %s458_s26 = smov 4  }
  0x11   :  { %24 = dma.hbm_to_vmem [thread:$0]  %s527_s1, 1024, %s19_s16, [#allocation4], %s457_s25, %s457_s25, %s458_s26  }
  0x12   :  { %452 = dma.done.wait [#allocation4], 1024  }
  0x13   :  { %453 = vsyncadd [#allocation4], 4294966272  ;;  %v459_v0 = vmov 0.0   ;;  %vm460_vm0 = vmmov 0   ;;  %v461_v1 = vmov 0   ;;  %v385_v2 = vld [vmem:[#allocation3] sm:$0xff]  }
  0x14   :  { %352 = vmatprep.subr.bf16.mxu0 %v459_v0  ;;  %368 = vmatprep.mubr.msk.bf16.mxu0 %vm460_vm0, %v459_v0  ;;  %v386_v3 = vld [vmem:[#allocation3 + $0x8] sm:$0xff]   ;;  %v387_v4 = vld [vmem:[#allocation3 + $0x10] sm:$0xff]   ;;  %v174_v5 = vld [vmem:[%s529_s3] sm:$0xff]  ;;  %vm204_vm1 = vcmask 1041408   ;;  %vm210_vm2 = vcmask 1043456   ;;  %vm286_vm3 = vcmask 41984  }
  0x15   :  { %384 = vset.pattern.permute.xlu0 %v461_v1  ;;  %372 = vmatprep.subr.mxu1 %v459_v0  ;;  %v388_v6 = vld [vmem:[#allocation3 + $0x18] sm:$0xff]   ;;  %v175_v7 = vld [vmem:[%s529_s3 + $0x8] sm:$0xff]  ;;  %v389_v8 = vld [vmem:[#allocation3 + $0x20] sm:$0xff]   ;;  %vm314_vm4 = vcmask 0  }
  0x16   :  { %374 = vmatprep.mubr.msk.f32.mxu1 %vm460_vm0, %v459_v0  ;;  %353 = vmatpush3.bf16.msra.mxu0 %v385_v2  ;;  %v390_v9 = vld [vmem:[#allocation3 + $0x28] sm:$0xff]   ;;  %v391_v10 = vld [vmem:[#allocation3 + $0x30] sm:$0xff]   ;;  %v392_v11 = vld [vmem:[#allocation3 + $0x38] sm:$0xff]  }
  0x17   :  { %354 = vmatprep.subr.bf16.mxu0 %v459_v0  ;;  %178 = vperm.xlu0 %384, %v174_v5   ;;  %v393_v12 = vld [vmem:[%s526_s0] sm:$0xff]   ;;  %s462_s0 = smov [#allocation6]  }
  0x18   :  { %v340_v13 = vld [vmem:[%s528_s2] ss:$0 sm:$0xff]  ;;  %s322_s2 = sshll.u32 %s462_s0, 4  ;;  %s323_s2 = int_to_ptr.vmem [resolvable:$true] %s322_s2 }
  0x19   :  { %s430_s9 = scalar_lea.vmem %s323_s2, 16  ;;  %s434_s10 = scalar_lea.vmem %s323_s2, 32 }
  0x1a   :  { %355 = vmatpush3.bf16.msra.mxu0 %v386_v3  ;;  %p431_p8 = scmp.ne.s32.totalorder %s323_s2, %s430_s9  ;;  %p435_p9 = scmp.lt.s32.totalorder %s323_s2, %s323_s2 }
  0x1b   :  { %356 = vmatprep.subr.bf16.mxu0 %v459_v0  ;;  %183 = vperm.xlu0 %384, %v175_v7   ;;  %p436_p10 = scmp.lt.s32.totalorder %s434_s10, %s430_s9 }
  0x1d   :  { %p437_p11 = por %p436_p10, %p435_p9 }
  0x1e   :  { %357 = vmatpush3.bf16.msra.mxu0 %v387_v4 }
  0x1f   :  { %358 = vmatprep.subr.bf16.mxu0 %v459_v0  ;;  %p438_p12 = pnand %p437_p11, %p431_p8 }
  0x22   :  { %359 = vmatpush3.bf16.msra.mxu0 %v388_v6 }
  0x23   :  { %360 = vmatprep.subr.bf16.mxu0 %v459_v0 }
  0x26   :  { %361 = vmatpush3.bf16.msra.mxu0 %v389_v8 }
  0x27   :  { %362 = vmatprep.subr.bf16.mxu0 %v459_v0 }
  0x2a   :  { %363 = vmatpush3.bf16.msra.mxu0 %v390_v9 }
  0x2b   :  { %364 = vmatprep.subr.bf16.mxu0 %v459_v0 }
  0x2e   :  { %365 = vmatpush3.bf16.msra.mxu0 %v391_v10 }
  0x2f   :  { %366 = vmatprep.subr.bf16.mxu0 %v459_v0 }
  0x32   :  { %367 = vmatpush3.bf16.msra.mxu0 %v392_v11 }
  0x35   :  { %369 = vmatmul.mubr.bf16.vlgmr.msra.gmra.mrb[0].mxu0 %v393_v12 }
  0x96   :  { %v179_v20 = vpop.permute.xlu0 %178 }
  0x9a   :  { %v184_v24 = vpop.permute.xlu0 %183 }
 0x108   :  { %v147_v14 = vpop.f32.mrb[0].mxu0 }
 0x109   :  { %v170_v15 = vadd.f32 %v340_v13, %v147_v14  ;;  %v370_v16 = vpop.f32.mrb[1].mxu0 }
 0x10a   :  { %v150_v17 = vpop.f32.mrb[2].mxu0 }
 0x10b   :  { %394 = vtanh.f32 %v170_v15  ;;  %v171_v18 = vadd.f32 %v340_v13, %v150_v17  ;;  %v371_v19 = vpop.f32.mrb[3].mxu0 }
 0x10d   :  { %396 = vtanh.f32 %v171_v18 }
 0x115   :  { %v395_v21 = vpop.eup %394 }
 0x116   :  { %v186_v22 = vmul.f32 %v395_v21, %v179_v20 }
 0x117   :  { %v397_v23 = vpop.eup %396 }
 0x118   :  { %v187_v25 = vmul.f32 %v397_v23, %v184_v24  ;;  %v188_v26 = vmul.f32 %v186_v22, %v186_v22 }
 0x11a   :  { %190 = vadd.xlane.f32.xlu1 %v188_v26  ;;  %v189_v27 = vmul.f32 %v187_v25, %v187_v25 }
 0x11e   :  { %192 = vadd.xlane.f32.xlu1 %v189_v27 }
 0x1a7   :  { %v191_v28 = vpop.xlane.xlu1 %190 }
 0x1a8   :  { %v194_v29 = vmax.f32 %v191_v28, 1e-24 }
 0x1aa   :  { %398 = vrsqrt.f32 %v194_v29 }
 0x1ab   :  { %v193_v30 = vpop.xlane.xlu1 %192 }
 0x1ac   :  { %v195_v31 = vmax.f32 %v193_v30, 1e-24 }
 0x1ae   :  { %400 = vrsqrt.f32 %v195_v31 }
 0x1b4   :  { %v399_v32 = vpop.eup %398 }
 0x1b5   :  { %v198_v33 = vmul.f32 %v399_v32, %v186_v22 }
 0x1b7   :  { %v201_v34 = vrot.slane %v198_v33, 2  ;;  %v211_v39 = vrot.slane %v198_v33, 4 }
 0x1b8   :  { %v401_v35 = vpop.eup %400 }
 0x1b9   :  { %v203_v36 = vmul.f32 %v201_v34, %v198_v33  ;;  %v199_v37 = vmul.f32 %v401_v35, %v187_v25 }
 0x1bb   :  { %v205_v38 = vsel %vm204_vm1, %v203_v36, 0.0  ;;  %v212_v40 = vrot.slane %v199_v37, 4 }
 0x1bc   :  { %206 = vadd.xlane.f32.xlu0 %v205_v38 }
 0x1bd   :  { %v213_v41 = vsel %vm210_vm2, %v211_v39, %v212_v40 }
 0x1be   :  { %373 = vmatpush3.xpose.msra.mxu1 %v213_v41 }
 0x1c1   :  { %375 = vmatmul.mubr.f32.vlgmr.msra.gmra.mrb[0].mxu1 %v198_v33 }
 0x249   :  { %v207_v46 = vpop.xlane.xlu0 %206 }
 0x24a   :  { %v208_v47 = vmul.f32 50.0, %v207_v46 }
 0x294   :  { %v281_v42 = vpop.f32.mrb[0].mxu1 }
 0x295   :  { %v285_v43 = vmul.f32 50.0, %v281_v42  ;;  %v376_v44 = vpop.f32.mrb[1].mxu1 }
 0x297   :  { %v287_v45 = vsel %vm286_vm3, %v285_v43, -inf }
 0x298   :  { %288 = vmax.xlane.f32.xlu1 %v287_v45 }
 0x325   :  { %v289_v48 = vpop.xlane.xlu1 %288 }
 0x326   :  { %v290_v49 = vmax.f32 %v208_v47, %v289_v48 }
 0x328   :  { %v294_v50 = vsub.f32 %v285_v43, %v290_v49  ;;  %v291_v54 = vsub.f32 %v208_v47, %v290_v49 }
 0x32a   :  { %v295_v51 = vmul.f32 1.442695, %v294_v50  ;;  %v292_v55 = vmul.f32 1.442695, %v291_v54 }
 0x32c   :  { %402 = vpow2.f32 %v295_v51 }
 0x32d   :  { %404 = vpow2.f32 %v292_v55 }
 0x336   :  { %v403_v52 = vpop.eup %402 }
 0x337   :  { %v297_v53 = vsel %vm286_vm3, %v403_v52, 0.0  ;;  %v405_v56 = vpop.eup %404 }
 0x338   :  { %298 = vadd.xlane.f32.xlu1 %v297_v53 }
 0x3c5   :  { %v299_v57 = vpop.xlane.xlu1 %298 }
 0x3c6   :  { %v300_v58 = vadd.f32 %v405_v56, %v299_v57 }
 0x3c8   :  { %406 = vlog2.f32 %v300_v58 }
 0x3d2   :  { %v407_v59 = vpop.eup %406 }
 0x3d3   :  { %v302_v60 = vmul.f32 0.6931472, %v407_v59 }
 0x3d5   :  { %v303_v61 = vadd.f32 %v302_v60, %v290_v49 }
 0x3d7   :  { %v304_v62 = vsub.f32 %v303_v61, %v208_v47 }
 0x3d9   :  { %v305_v63 = vsel %vm204_vm1, %v304_v62, 0.0 }
 0x3da   :  { %v306_v0 = vrot.slane %v305_v63, 4 }
 0x3dc   :  { %v307_v1 = vadd.f32 %v306_v0, %v305_v63 }
 0x3de   :  { %v308_v2 = vrot.slane %v307_v1, 2 }
 0x3e0   :  { %v309_v3 = vadd.f32 %v308_v2, %v307_v1 }
 0x3e2   :  { %v310_v4 = vrot.slane %v309_v3, 1 }
 0x3e4   :  { %v311_v5 = vadd.f32 %v310_v4, %v309_v3 }
 0x3e6   :  { %v313_v6 = vmul.f32 0.5, %v311_v5 }
 0x3e8   :  { %315 = vst.msk [vmem:[#allocation6] sm:$0x1] %vm314_vm4, %v313_v6 }
 0x3e9   :  { %441 = shalt.err (!%p438_p12)
}
 0x3ea   :  { %s442_s13 = scalar_lea.hbm %s530_s4, 16 }
 0x3eb   :  { %p443_p13 = scmp.ne.s32.totalorder %s530_s4, %s442_s13  ;;  %p446_p0 = scmp.lt.u32.totalorder %s442_s13, %s530_s4 }
 0x3ed   :  { %p448_p1 = pnand %p446_p0, %p443_p13 }
 0x3ef   :  { %451 = shalt.err (!%p448_p1)
}
 0x3f0   :  { %325 = dma.vmem_to_hbm [thread:$0]  %s323_s2, 16, %s530_s4, [#allocation5]  }
 0x3f1   :  { %454 = dma.done.wait [#allocation5], 16  }
 0x3f2   :  { %455 = vsyncadd [#allocation5], 4294967280 }
 0x3f3   :  { %329 = vsyncpa [#allocation4], 1 }
 0x3f4   :  { %330 = vsyncpa [#allocation5], 1 }

</bundles_post_ra>
